<compile_context>
chip_gen: v7x
topology: tpu7x:2x2x1
jax: 0.10.0
libtpu: 0.0.40
codegen_flags: <defaults>
</compile_context>

<pallas_src>
import numpy as np
import jax
import jax.numpy as jnp
from jax.experimental import pallas as pl
from jax.experimental.pallas import tpu as pltpu


def _relational_kernel(hist_ref, out_ref):
    hist = hist_ref[...]                               # (tm, A) f32
    s = jnp.sum(hist, axis=-1, keepdims=True)          # row reduction -> XLU slot
    # Map-miss rows are all-zero: force denom=1 so norm=0 -> sigmoid(0)=0.5.
    denom = s + (s <= 0.0).astype(s.dtype)             # zero-row guard without a select
    norm = hist / denom                                # tiny per-row broadcast divide
    # sigmoid(x) = 0.5*(tanh(x/2)+1): one EUP transcendental, no VALU exp/div chain.
    out_ref[...] = 0.5 * (jnp.tanh(0.5 * norm) + 1.0)


def relational_distribution(hist, *, tile_rows=2048):
    """hist: (b, A) float32.  Returns sigmoid(row-L1-normalized hist), (b, A)."""
    b, a = hist.shape
    if b <= tile_rows:
        tm = b                     # block == full array dim -> always legal
    else:
        tm = max(8, (tile_rows // 8) * 8)   # keep sublane-dim multiple of 8 when tiling
    return pl.pallas_call(
        _relational_kernel,
        out_shape=jax.ShapeDtypeStruct((b, a), jnp.float32),
        grid=(pl.cdiv(b, tm),),
        in_specs=[pl.BlockSpec((tm, a), lambda i: (i, 0))],
        out_specs=pl.BlockSpec((tm, a), lambda i: (i, 0)),
        compiler_params=pltpu.CompilerParams(dimension_semantics=("parallel",)),
    )(hist)


class RelationalJAX:
    """JAX/Pallas port of lib/gnn.Relational (inference path)."""

    def __init__(self, obj_classes, action_class_num=157):
        self.obj_classes = obj_classes
        self.action_class_num = action_class_num
        self.map = {}          # object-string -> accumulated action histogram (np [157])
        self.training = False  # eval mode

    @staticmethod
    def get_object_string(objects):
        vals = sorted(int(x) for x in objects)
        return "-".join(str(v) for v in vals)

    def forward(self, entry):
        entry["pred_labels"] = entry["labels"]
        im_idx = np.asarray(entry["im_idx"])
        b = int(im_idx[-1] + 1)
        pair_idx = np.asarray(entry["pair_idx"])
        obj_class = np.asarray(entry["pred_labels"])[pair_idx[:, 1]]

        # TODO(synk): training-mode accumulation into self.map is python-dict state
        # keyed by strings; no Pallas equivalent, kept host-side (as in the original).
        # Build the whole histogram batch once and do a single H2D transfer.
        hist = np.zeros((b, self.action_class_num), dtype=np.float32)
        for i in range(b):
            objects = obj_class[im_idx == i]
            key = self.get_object_string(objects)
            if key in self.map:
                hist[i] = self.map[key]

        out = relational_distribution(jnp.asarray(hist))
        entry["action_class_distribution"] = out
        return entry


if __name__ == "__main__":
    key = jax.random.PRNGKey(0)
    k1, k2, k3 = jax.random.split(key, 3)

    obj_classes = 36
    action_class_num = 157
    num_objs = 10      # detected boxes across the batch
    num_pairs = 8      # human-object pairs
    b = 2              # images

    labels = jax.random.randint(k1, (num_objs,), 1, obj_classes, dtype=jnp.int32)
    pair_obj = jax.random.randint(k2, (num_pairs,), 0, num_objs, dtype=jnp.int32)
    pair_sub = jnp.zeros((num_pairs,), jnp.int32)
    pair_idx = jnp.stack([pair_sub, pair_obj], axis=1)          # [8, 2]
    im_idx = jnp.array([0, 0, 0, 0, 1, 1, 1, 1], dtype=jnp.int32)

    model = RelationalJAX(obj_classes, action_class_num)

    # Deterministically pre-populate the relational map so image 0 gets a hit.
    obj_class_np = np.asarray(labels)[np.asarray(pair_idx)[:, 1]]
    key0 = model.get_object_string(obj_class_np[np.asarray(im_idx) == 0])
    model.map[key0] = np.asarray(
        jax.random.uniform(k3, (action_class_num,), minval=0.1, maxval=5.0),
        dtype=np.float32,
    )

    entry = {"labels": labels, "im_idx": im_idx, "pair_idx": pair_idx}
    entry = model.forward(entry)
    dist = jax.block_until_ready(entry["action_class_distribution"])
    assert dist.shape == (b, action_class_num)

    # Pure-numpy reference of the PyTorch forward semantics.
    ref = np.zeros((b, action_class_num), np.float32)
    for i in range(b):
        k = model.get_object_string(obj_class_np[np.asarray(im_idx) == i])
        if k in model.map:
            v = model.map[k]
            ref[i] = v / v.sum()
    ref = 1.0 / (1.0 + np.exp(-ref))
    assert np.allclose(np.asarray(dist), ref, atol=1e-5), "kernel/reference mismatch"

    print("KERNEL_OK")
</pallas_src>

<mosaic_0001>
module attributes {stable_mosaic.version = 11 : i64} {
  func.func @_relational_kernel(%arg0: i32, %arg1: memref<2x157xf32, #tpu.memory_space<vmem>>, %arg2: memref<2x157xf32, #tpu.memory_space<vmem>>) attributes {dimension_semantics = [#tpu.dimension_semantics<parallel>], iteration_bounds = array<i64: 1>, scalar_prefetch = 0 : i64, scratch_operands = 0 : i64, tpu.core_type = #tpu.core_type<tc>, window_params = [{transform_indices = @transform_0, window_bounds = array<i64: 2, 157>}, {transform_indices = @transform_1, window_bounds = array<i64: 2, 157>}]} {
    %c0 = arith.constant 0 : index
    %c0_0 = arith.constant 0 : index
    %0 = vector.load %arg1[%c0, %c0_0] : memref<2x157xf32, #tpu.memory_space<vmem>>, vector<2x157xf32>
    %cst = arith.constant dense<0.000000e+00> : vector<2xf32>
    %1 = vector.multi_reduction <add>, %0, %cst [1] : vector<2x157xf32> to vector<2xf32>
    %2 = vector.shape_cast %1 : vector<2xf32> to vector<2x1xf32>
    %cst_1 = arith.constant 0.000000e+00 : f32
    %3 = vector.broadcast %cst_1 : f32 to vector<2x1xf32>
    %4 = arith.cmpf ole, %2, %3 : vector<2x1xf32>
    %5 = arith.extui %4 : vector<2x1xi1> to vector<2x1xi32>
    %6 = arith.sitofp %5 : vector<2x1xi32> to vector<2x1xf32>
    %7 = arith.addf %2, %6 : vector<2x1xf32>
    %8 = vector.broadcast %7 : vector<2x1xf32> to vector<2x157xf32>
    %9 = arith.divf %0, %8 : vector<2x157xf32>
    %cst_2 = arith.constant 5.000000e-01 : f32
    %10 = vector.broadcast %cst_2 : f32 to vector<2x157xf32>
    %11 = arith.mulf %10, %9 : vector<2x157xf32>
    %12 = math.tanh %11 : vector<2x157xf32>
    %cst_3 = arith.constant 1.000000e+00 : f32
    %13 = vector.broadcast %cst_3 : f32 to vector<2x157xf32>
    %14 = arith.addf %12, %13 : vector<2x157xf32>
    %cst_4 = arith.constant 5.000000e-01 : f32
    %15 = vector.broadcast %cst_4 : f32 to vector<2x157xf32>
    %16 = arith.mulf %15, %14 : vector<2x157xf32>
    %c0_5 = arith.constant 0 : index
    %c0_6 = arith.constant 0 : index
    %17 = vector.load %arg2[%c0_5, %c0_6] : memref<2x157xf32, #tpu.memory_space<vmem>>, vector<2x157xf32>
    tpu.vector_store %arg2[%c0_5, %c0_6], %16 {strides = array<i32>} : memref<2x157xf32, #tpu.memory_space<vmem>>, vector<2x157xf32>,
    return
  }
  func.func @transform_0(%arg0: i32) -> (i32, i32) {
    %c0_i32 = arith.constant 0 : i32
    %c0_i32_0 = arith.constant 0 : i32
    return %arg0, %c0_i32 : i32, i32
  }
  func.func @transform_1(%arg0: i32) -> (i32, i32) {
    %c0_i32 = arith.constant 0 : i32
    %c0_i32_0 = arith.constant 0 : i32
    return %arg0, %c0_i32 : i32, i32
  }
}

</mosaic_0001>

<bundles_post_ra>
// kernel: tpu_custom_call.1
= control target key start
LH: loop header
LB: loop body
LE: loop exit
PB: predicated region body
PF: predicated region fallthrough
CT: control target
= control target key end

     0   :  { %6 = vsyncpa [#allocation3], 0  ;;  %s176_s0 = inlined_call_operand.hbm [shape: f32[2,157], index: 0, kind: input, shape index: {}]   ;;  %s177_s1 = inlined_call_operand.hbm [shape: f32[2,157], index: 1, kind: output, shape index: {}]  }
   0x1   :  { %7 = vsyncpa [#allocation4], 0  ;;  %s135_s6 = smov [#allocation2]   ;;  %s87_s10 = scalar_lea.hbm %s176_s0, 64 }
   0x2   :  { %s14_s7 = sshll.u32 %s135_s6, 4  ;;  %p88_p0 = scmp.ne.s32.totalorder %s176_s0, %s87_s10  ;;  %s15_s7 = int_to_ptr.vmem [resolvable:$true] %s14_s7 }
   0x3   :  { %p91_p1 = scmp.lt.u32.totalorder %s87_s10, %s176_s0 }
   0x5   :  { %p93_p2 = pnand %p91_p1, %p88_p0 }
   0x7   :  { %96 = shalt.err (!%p93_p2)
}
   0x8   :  { %s97_s15 = scalar_lea.vmem %s15_s7, 64  ;;  %p102_p4 = scmp.lt.s32.totalorder %s15_s7, %s15_s7 }
   0x9   :  { %p98_p3 = scmp.ne.s32.totalorder %s15_s7, %s97_s15  ;;  %p103_p5 = scmp.lt.s32.totalorder %s97_s15, %s97_s15 }
   0xb   :  { %p104_p6 = por %p103_p5, %p102_p4 }
   0xd   :  { %p105_p7 = pnand %p104_p6, %p98_p3 }
   0xf   :  { %108 = shalt.err (!%p105_p7)
}
  0x10   :  { %17 = dma.hbm_to_vmem [thread:$0]  %s176_s0, 64, %s15_s7, [#allocation3]  }
  0x11   :  { %131 = dma.done.wait [#allocation3], 64  }
  0x12   :  { %132 = vsyncadd [#allocation3], 4294967232  ;;  %v26_v0 = vlaneseq  ;;  %v136_v1 = vmov 1983009808   ;;  %v21_v6 = vld [vmem:[#allocation2] sm:$0xf] }
  0x13   :  { %v24_v2 = vunpack.c.l.s4 %v136_v1  ;;  %vm33_vm0 = vcmask 1041408   ;;  %vm35_vm1 = vcmask 230400   ;;  %v137_v12 = vmov 269488144   ;;  %s139_s0 = smov [#allocation5]  }
  0x14   :  { %v27_v3 = vshrl.u32 %v26_v0, 7  ;;  %v46_v13 = vunpack.c.l.s4 %v137_v12  ;;  %v138_v17 = vmov 0.0   ;;  %vm59_vm3 = vcmask 232450   ;;  %s68_s18 = sshll.u32 %s139_s0, 4  ;;  %s69_s18 = int_to_ptr.vmem [resolvable:$true] %s68_s18 }
  0x15   :  { %v25_v4 = vunpack.c.0.s8 %v24_v2  ;;  %vm60_vm4 = vmor %vm59_vm3, %vm33_vm0  ;;  %s109_s19 = scalar_lea.vmem %s69_s18, 64  ;;  %p114_p9 = scmp.lt.s32.totalorder %s69_s18, %s69_s18 }
  0x16   :  { %v47_v14 = vunpack.c.0.s8 %v46_v13  ;;  %p110_p8 = scmp.ne.s32.totalorder %s69_s18, %s109_s19  ;;  %p115_p10 = scmp.lt.s32.totalorder %s109_s19, %s109_s19 }
  0x17   :  { %v28_v5 = vsub.s32 %v25_v4, %v27_v3 }
  0x18   :  { %v50_v16 = vsub.s32 %v47_v14, %v27_v3  ;;  %p116_p11 = por %p115_p10, %p114_p9 }
  0x19   :  { %v29_v7 = vrot.slane %v21_v6, %v28_v5 }
  0x1a   :  { %p117_p12 = pnand %p116_p11, %p110_p8 }
  0x1b   :  { %v30_v8 = vcombine.high %v29_v7, %v29_v7  ;;  %v34_v9 = vsel %vm33_vm0, %v29_v7, 0.0 }
  0x1d   :  { %v36_v10 = vsel %vm35_vm1, %v30_v8, 0.0 }
  0x1e   :  { %v37_v11 = vadd.f32 %v36_v10, %v34_v9 }
  0x20   :  { %38 = vadd.xlane.f32.xlu0 %v37_v11 }
  0xad   :  { %v39_v15 = vpop.xlane.xlu0 %38 }
  0xae   :  { %vm40_vm2 = vcmp.le.f32.partialorder %v39_v15, 0.0 }
  0xaf   :  { %v77_v18 = vsel %vm40_vm2, 1.0, %v138_v17 }
  0xb0   :  { %v43_v19 = vadd.f32 %v77_v18, %v39_v15 }
  0xb2   :  { %v51_v20 = vrot.slane %v43_v19, %v50_v16 }
  0xb4   :  { %83 = vrcp.f32 %v51_v20 }
  0xbe   :  { %v84_v21 = vpop.eup %83 }
  0xbf   :  { %v54_v22 = vmul.f32 %v84_v21, %v21_v6 }
  0xc1   :  { %v55_v23 = vmul.f32 0.5, %v54_v22 }
  0xc3   :  { %85 = vtanh.f32 %v55_v23 }
  0xcd   :  { %v86_v24 = vpop.eup %85 }
  0xce   :  { %v57_v25 = vadd.f32 1.0, %v86_v24 }
  0xd0   :  { %v58_v26 = vmul.f32 0.5, %v57_v25 }
  0xd2   :  { %61 = vst.msk [vmem:[#allocation5] sm:$0xf] %vm60_vm4, %v58_v26 }
  0xd3   :  { %120 = shalt.err (!%p117_p12)
}
  0xd4   :  { %s121_s22 = scalar_lea.hbm %s177_s1, 64 }
  0xd5   :  { %p122_p13 = scmp.ne.s32.totalorder %s177_s1, %s121_s22  ;;  %p125_p0 = scmp.lt.u32.totalorder %s121_s22, %s177_s1 }
  0xd7   :  { %p127_p1 = pnand %p125_p0, %p122_p13 }
  0xd9   :  { %130 = shalt.err (!%p127_p1)
}
  0xda   :  { %71 = dma.vmem_to_hbm [thread:$0]  %s69_s18, 64, %s177_s1, [#allocation4]  }
  0xdb   :  { %133 = dma.done.wait [#allocation4], 64  }
  0xdc   :  { %134 = vsyncadd [#allocation4], 4294967232 }
  0xdd   :  { %75 = vsyncpa [#allocation3], 1 }
  0xde   :  { %76 = vsyncpa [#allocation4], 1 }

</bundles_post_ra>
